<compile_context>
chip_gen: v5e
topology: v5e:2x2
jax: 0.10.0
libtpu: 0.0.40
codegen_flags: <defaults>
</compile_context>

<pallas_src>
import functools
import math

import jax
import jax.numpy as jnp
from jax.experimental import pallas as pl
from jax.experimental.pallas import tpu as pltpu


def _focal_kernel(x_ref, t_ref, out_ref, acc_ref, *, gamma, alpha,
                  num_classes, hw, t_sub, blocks_per_group, num_groups,
                  needs_mask):
    """Grid = (batch_row i, group g, pixel block j).

    x_ref : (1, C, t_sub, 128) logits block (classes = outer planes)
    t_ref : (1, 1, t_sub, 128) int32 target block
    out_ref: (1, 1, 128)       per-(row, group) partial sum (lane 0)
    acc_ref: (t_sub, 128)      f32 dense loss accumulator (resident scratch)
    """
    g = pl.program_id(1)
    j = pl.program_id(2)

    @pl.when(j == 0)
    def _():
        acc_ref[...] = jnp.zeros_like(acc_ref)

    t = t_ref[0, 0]                                       # (t_sub, 128) int32

    # log_softmax over the class planes: elementwise across C planes, all ops
    # on dense (t_sub, 128) tiles (pure VPU + C EUP exp pushes).
    m = x_ref[0, 0].astype(jnp.float32)
    for c in range(1, num_classes):
        m = jnp.maximum(m, x_ref[0, c].astype(jnp.float32))

    sum_exp = jnp.zeros_like(m)
    z_t = jnp.zeros_like(m)                               # z at target class
    for c in range(num_classes):
        z = x_ref[0, c].astype(jnp.float32) - m
        sum_exp = sum_exp + jnp.exp(z)
        z_t = jnp.where(t == c, z, z_t)                   # one-hot gather

    logpt = z_t - jnp.log(sum_exp)                        # (t_sub, 128)

    # Focal modulator with compile-time fast paths on gamma.  -alpha is
    # folded into the epilogue.
    if gamma == 0.0:
        modulated = logpt
    elif float(gamma).is_integer() and 0.0 < gamma <= 8.0:
        one_m_pt = 1.0 - jnp.exp(logpt)
        mod = one_m_pt
        for _ in range(int(gamma) - 1):
            mod = mod * one_m_pt
        modulated = mod * logpt
    else:
        base = jnp.maximum(1.0 - jnp.exp(logpt), 0.0)     # guard fp rounding
        modulated = jnp.power(base, jnp.float32(gamma)) * logpt

    if needs_mask:
        # Only the globally last pixel block can contain padded / OOB pixels;
        # interior blocks accumulate unmasked (no iota/compare/select there).
        is_last = jnp.logical_and(g == num_groups - 1,
                                  j == blocks_per_group - 1)

        @pl.when(jnp.logical_not(is_last))
        def _():
            acc_ref[...] += modulated

        @pl.when(is_last)
        def _():
            sub = jax.lax.broadcasted_iota(jnp.int32, (t_sub, 128), 0)
            lane = jax.lax.broadcasted_iota(jnp.int32, (t_sub, 128), 1)
            pix = ((g * blocks_per_group + j) * t_sub + sub) * 128 + lane
            acc_ref[...] += jnp.where(pix < hw, modulated, 0.0)
    else:
        acc_ref[...] += modulated

    @pl.when(j == pl.num_programs(2) - 1)
    def _():
        s = (-alpha) * jnp.sum(acc_ref[...])              # one tiny reduce
        lane = jax.lax.broadcasted_iota(jnp.int32, (1, 1, 128), 2)
        out_ref[...] = jnp.where(lane == 0, s, 0.0)


def _choose_t_sub(hw_blocks, c, itemsize, budget_bytes, cap=256):
    """Sublane-block tile size (pixels per tile = t_sub * 128).

    Accounts for double-buffering of both pipelined inputs; capped so the
    working set stays a couple of MiB on all generations (v7x: 64 MiB VMEM).
    """
    mult = max(8, 32 // itemsize)           # sublane multiple for the dtype
    if hw_blocks <= mult:
        return hw_blocks                    # full extent — always legal
    bytes_per_row = 2 * (c * itemsize + 4) * 128   # 2x-buffered logits+target
    t = max(mult, (budget_bytes // bytes_per_row) // mult * mult)
    t = min(t, cap)
    if t >= hw_blocks:
        return hw_blocks
    # Balance block sizes so the tail block isn't mostly padding.
    num_j = -(-hw_blocks // t)
    t = ((-(-hw_blocks // num_j) + mult - 1) // mult) * mult
    return min(t, hw_blocks)


def focal_loss(logits, target, *, gamma=0.0, alpha=1.0, size_average=True,
               block_budget_bytes=2 << 20):
    """Focal loss matching PyTorch FocalLoss.forward(). Returns f32 scalar.

    logits: (N, C, *spatial) or (M, C); target: matching int class indices.
    """
    if logits.ndim > 2:
        n, c = logits.shape[0], logits.shape[1]
        hw = math.prod(logits.shape[2:])
        x = logits.reshape(n, c, hw)                      # free view
        t = target.reshape(n, 1, hw).astype(jnp.int32)
    else:
        # 2-D (rows, classes): one XLA transpose (extra HBM pass) to reach the
        # classes-as-planes layout.
        # TODO(synk): transpose-free 2-D layout (classes on lanes) if the
        # (M, C) path ever becomes hot.
        m, c = logits.shape
        n, hw = 1, m
        x = logits.T.reshape(1, c, m)
        t = target.reshape(1, 1, m).astype(jnp.int32)

    total_rows = n * hw

    # Pad the pixel axis to a multiple of 128 (no copy when already aligned),
    # then view pixels as (sublane-blocks, 128 lanes).
    hw_pad = ((hw + 127) // 128) * 128
    if hw_pad != hw:
        x = jnp.pad(x, ((0, 0), (0, 0), (0, hw_pad - hw)))
        t = jnp.pad(t, ((0, 0), (0, 0), (0, hw_pad - hw)))
    hw_blocks = hw_pad // 128
    x4 = x.reshape(n, c, hw_blocks, 128)
    t4 = t.reshape(n, 1, hw_blocks, 128)

    itemsize = jnp.dtype(logits.dtype).itemsize
    t_sub = _choose_t_sub(hw_blocks, c, itemsize, block_budget_bytes)
    num_j = pl.cdiv(hw_blocks, t_sub)

    # v7x: when the batch axis is trivial, split the pixel blocks into two
    # parallel groups so the second TensorCore gets work (no effect on 1-TC
    # v5e/v6e).  Only split evenly so the tail mask stays on one block.
    num_groups = 2 if (n == 1 and num_j >= 2 and num_j % 2 == 0) else 1
    bpg = num_j // num_groups

    needs_mask = (num_j * t_sub * 128) != hw

    kernel = functools.partial(
        _focal_kernel,
        gamma=float(gamma),
        alpha=float(alpha),
        num_classes=c,
        hw=hw,
        t_sub=t_sub,
        blocks_per_group=bpg,
        num_groups=num_groups,
        needs_mask=needs_mask,
    )

    # Actual padded VMEM footprint: double-buffered logits + target blocks,
    # the f32 accumulator scratch, and the (padded) output block.
    block_bytes = (2 * (c * itemsize + 4) * t_sub * 128
                   + max(t_sub, 8) * 128 * 4
                   + 2 * 8 * 128 * 4)
    vmem_limit = int(min(max(8 << 20, 2 * block_bytes), 64 << 20))

    partials = pl.pallas_call(
        kernel,
        out_shape=jax.ShapeDtypeStruct((n * num_groups, 1, 128), jnp.float32),
        grid_spec=pltpu.PrefetchScalarGridSpec(
            num_scalar_prefetch=0,
            grid=(n, num_groups, bpg),
            in_specs=[
                pl.BlockSpec((1, c, t_sub, 128),
                             lambda i, g, j: (i, 0, g * bpg + j, 0)),  # logits
                pl.BlockSpec((1, 1, t_sub, 128),
                             lambda i, g, j: (i, 0, g * bpg + j, 0)),  # target
            ],
            out_specs=pl.BlockSpec((1, 1, 128),
                                   lambda i, g, j: (i * num_groups + g, 0, 0)),
            scratch_shapes=[pltpu.VMEM((t_sub, 128), jnp.float32)],
        ),
        compiler_params=pltpu.CompilerParams(
            # (batch, group) axes independent (megacore on v7x); pixel-block
            # axis is the sequential reduction into the resident accumulator.
            dimension_semantics=("parallel", "parallel", "arbitrary"),
            vmem_limit_bytes=vmem_limit,
        ),
    )(x4, t4)

    total = jnp.sum(partials)                 # tiny cross-row reduce outside
    if size_average:
        return total / jnp.float32(total_rows)
    return total


def _reference_focal_loss(logits, target, gamma=0.0, alpha=1.0,
                          size_average=True):
    """Pure-JAX reference mirroring the PyTorch code path."""
    if logits.ndim > 2:
        n, c = logits.shape[0], logits.shape[1]
        x = logits.reshape(n, c, -1).transpose(0, 2, 1).reshape(-1, c)
    else:
        x = logits
    t = target.reshape(-1)
    logsm = jax.nn.log_softmax(x.astype(jnp.float32), axis=1)
    logpt = jnp.take_along_axis(logsm, t[:, None].astype(jnp.int32), axis=1)[:, 0]
    pt = jnp.exp(logpt)
    loss = -alpha * (1.0 - pt) ** gamma * logpt
    return loss.mean() if size_average else loss.sum()


if __name__ == "__main__":
    key = jax.random.PRNGKey(0)
    k1, k2, k3, k4 = jax.random.split(key, 4)

    # Primary case: NCHW segmentation-style logits, module defaults
    # (gamma=0, alpha=1, size_average=True).
    N, C, H, W = 2, 4, 16, 16
    x = jax.random.normal(k1, (N, C, H, W), dtype=jnp.float32)
    tgt = jax.random.randint(k2, (N, H, W), minval=0, maxval=C,
                             dtype=jnp.int32)

    out = jax.block_until_ready(focal_loss(x, tgt))
    ref = _reference_focal_loss(x, tgt)
    assert jnp.allclose(out, ref, rtol=1e-5, atol=1e-5), (out, ref)

    # Non-trivial integer gamma / alpha with sum reduction.
    out2 = jax.block_until_ready(
        focal_loss(x, tgt, gamma=2.0, alpha=0.25, size_average=False))
    ref2 = _reference_focal_loss(x, tgt, gamma=2.0, alpha=0.25,
                                 size_average=False)
    assert jnp.allclose(out2, ref2, rtol=1e-5, atol=1e-5), (out2, ref2)

    # Ragged spatial extent (H*W=169) exercising the wrapper pad + tail-block
    # lane mask, plus a fractional gamma (jnp.power path).
    N2, C2, H2, W2 = 2, 4, 13, 13
    x2 = jax.random.normal(k3, (N2, C2, H2, W2), dtype=jnp.float32)
    tgt2 = jax.random.randint(k4, (N2, H2, W2), minval=0, maxval=C2,
                              dtype=jnp.int32)
    out3 = jax.block_until_ready(
        focal_loss(x2, tgt2, gamma=1.5, alpha=0.5, size_average=True))
    ref3 = _reference_focal_loss(x2, tgt2, gamma=1.5, alpha=0.5,
                                 size_average=True)
    assert jnp.allclose(out3, ref3, rtol=1e-5, atol=1e-5), (out3, ref3)

    # TODO(synk): per-class alpha tensors (a common FocalLoss extension) are
    # not part of this module's forward and are not implemented.
    print("KERNEL_OK")
</pallas_src>

<mosaic_0001>
module attributes {stable_mosaic.version = 11 : i64} {
  func.func @_focal_kernel(%arg0: i32, %arg1: i32, %arg2: i32, %arg3: memref<1x4x2x128xf32, #tpu.memory_space<vmem>>, %arg4: memref<1x1x2x128xi32, #tpu.memory_space<vmem>>, %arg5: memref<1x1x128xf32, #tpu.memory_space<vmem>>, %arg6: memref<2x128xf32, #tpu.memory_space<vmem>>) attributes {dimension_semantics = [#tpu.dimension_semantics<parallel>, #tpu.dimension_semantics<parallel>, #tpu.dimension_semantics<arbitrary>], iteration_bounds = array<i64: 2, 1, 1>, scalar_prefetch = 0 : i64, scratch_operands = 1 : i64, tpu.core_type = #tpu.core_type<tc>, window_params = [{transform_indices = @transform_0, window_bounds = array<i64: 1, 4, 2, 128>}, {transform_indices = @transform_1, window_bounds = array<i64: 1, 1, 2, 128>}, {transform_indices = @transform_2, window_bounds = array<i64: 1, 1, 128>}]} {
    %c0_i32 = arith.constant 0 : i32
    %0 = arith.cmpi eq, %arg2, %c0_i32 : i32
    %1 = arith.extui %0 : i1 to i32
    %c0_i32_0 = arith.constant 0 : i32
    %2 = arith.cmpi ne, %1, %c0_i32_0 : i32
    scf.if %2 {
      %cst_41 = arith.constant 0.000000e+00 : f32
      %58 = vector.broadcast %cst_41 : f32 to vector<2x128xf32>
      %c0_42 = arith.constant 0 : index
      %c0_43 = arith.constant 0 : index
      %59 = vector.load %arg6[%c0_42, %c0_43] : memref<2x128xf32, #tpu.memory_space<vmem>>, vector<2x128xf32>
      tpu.vector_store %arg6[%c0_42, %c0_43], %58 {strides = array<i32>} : memref<2x128xf32, #tpu.memory_space<vmem>>, vector<2x128xf32>,
    } else {
    }
    %c0 = arith.constant 0 : index
    %c0_1 = arith.constant 0 : index
    %c0_2 = arith.constant 0 : index
    %c0_3 = arith.constant 0 : index
    %3 = vector.load %arg4[%c0, %c0_1, %c0_2, %c0_3] : memref<1x1x2x128xi32, #tpu.memory_space<vmem>>, vector<1x1x2x128xi32>
    %4 = vector.shape_cast %3 : vector<1x1x2x128xi32> to vector<2x128xi32>
    %c0_4 = arith.constant 0 : index
    %c0_5 = arith.constant 0 : index
    %c0_6 = arith.constant 0 : index
    %c0_7 = arith.constant 0 : index
    %5 = vector.load %arg3[%c0_4, %c0_5, %c0_6, %c0_7] : memref<1x4x2x128xf32, #tpu.memory_space<vmem>>, vector<1x1x2x128xf32>
    %6 = vector.shape_cast %5 : vector<1x1x2x128xf32> to vector<2x128xf32>
    %c0_8 = arith.constant 0 : index
    %c1 = arith.constant 1 : index
    %c0_9 = arith.constant 0 : index
    %c0_10 = arith.constant 0 : index
    %7 = vector.load %arg3[%c0_8, %c1, %c0_9, %c0_10] : memref<1x4x2x128xf32, #tpu.memory_space<vmem>>, vector<1x1x2x128xf32>
    %8 = vector.shape_cast %7 : vector<1x1x2x128xf32> to vector<2x128xf32>
    %9 = arith.maximumf %6, %8 : vector<2x128xf32>
    %c0_11 = arith.constant 0 : index
    %c2 = arith.constant 2 : index
    %c0_12 = arith.constant 0 : index
    %c0_13 = arith.constant 0 : index
    %10 = vector.load %arg3[%c0_11, %c2, %c0_12, %c0_13] : memref<1x4x2x128xf32, #tpu.memory_space<vmem>>, vector<1x1x2x128xf32>
    %11 = vector.shape_cast %10 : vector<1x1x2x128xf32> to vector<2x128xf32>
    %12 = arith.maximumf %9, %11 : vector<2x128xf32>
    %c0_14 = arith.constant 0 : index
    %c3 = arith.constant 3 : index
    %c0_15 = arith.constant 0 : index
    %c0_16 = arith.constant 0 : index
    %13 = vector.load %arg3[%c0_14, %c3, %c0_15, %c0_16] : memref<1x4x2x128xf32, #tpu.memory_space<vmem>>, vector<1x1x2x128xf32>
    %14 = vector.shape_cast %13 : vector<1x1x2x128xf32> to vector<2x128xf32>
    %15 = arith.maximumf %12, %14 : vector<2x128xf32>
    %cst = arith.constant 0.000000e+00 : f32
    %16 = vector.broadcast %cst : f32 to vector<2x128xf32>
    %cst_17 = arith.constant 0.000000e+00 : f32
    %17 = vector.broadcast %cst_17 : f32 to vector<2x128xf32>
    %c0_18 = arith.constant 0 : index
    %c0_19 = arith.constant 0 : index
    %c0_20 = arith.constant 0 : index
    %c0_21 = arith.constant 0 : index
    %18 = vector.load %arg3[%c0_18, %c0_19, %c0_20, %c0_21] : memref<1x4x2x128xf32, #tpu.memory_space<vmem>>, vector<1x1x2x128xf32>
    %19 = vector.shape_cast %18 : vector<1x1x2x128xf32> to vector<2x128xf32>
    %20 = arith.subf %19, %15 : vector<2x128xf32>
    %21 = math.exp %20 : vector<2x128xf32>
    %22 = arith.addf %16, %21 : vector<2x128xf32>
    %c0_i32_22 = arith.constant 0 : i32
    %23 = vector.broadcast %c0_i32_22 : i32 to vector<2x128xi32>
    %24 = arith.cmpi eq, %4, %23 : vector<2x128xi32>
    %25 = arith.select %24, %20, %17 : vector<2x128xi1>, vector<2x128xf32>
    %c0_23 = arith.constant 0 : index
    %c1_24 = arith.constant 1 : index
    %c0_25 = arith.constant 0 : index
    %c0_26 = arith.constant 0 : index
    %26 = vector.load %arg3[%c0_23, %c1_24, %c0_25, %c0_26] : memref<1x4x2x128xf32, #tpu.memory_space<vmem>>, vector<1x1x2x128xf32>
    %27 = vector.shape_cast %26 : vector<1x1x2x128xf32> to vector<2x128xf32>
    %28 = arith.subf %27, %15 : vector<2x128xf32>
    %29 = math.exp %28 : vector<2x128xf32>
    %30 = arith.addf %22, %29 : vector<2x128xf32>
    %c1_i32 = arith.constant 1 : i32
    %31 = vector.broadcast %c1_i32 : i32 to vector<2x128xi32>
    %32 = arith.cmpi eq, %4, %31 : vector<2x128xi32>
    %33 = arith.select %32, %28, %25 : vector<2x128xi1>, vector<2x128xf32>
    %c0_27 = arith.constant 0 : index
    %c2_28 = arith.constant 2 : index
    %c0_29 = arith.constant 0 : index
    %c0_30 = arith.constant 0 : index
    %34 = vector.load %arg3[%c0_27, %c2_28, %c0_29, %c0_30] : memref<1x4x2x128xf32, #tpu.memory_space<vmem>>, vector<1x1x2x128xf32>
    %35 = vector.shape_cast %34 : vector<1x1x2x128xf32> to vector<2x128xf32>
    %36 = arith.subf %35, %15 : vector<2x128xf32>
    %37 = math.exp %36 : vector<2x128xf32>
    %38 = arith.addf %30, %37 : vector<2x128xf32>
    %c2_i32 = arith.constant 2 : i32
    %39 = vector.broadcast %c2_i32 : i32 to vector<2x128xi32>
    %40 = arith.cmpi eq, %4, %39 : vector<2x128xi32>
    %41 = arith.select %40, %36, %33 : vector<2x128xi1>, vector<2x128xf32>
    %c0_31 = arith.constant 0 : index
    %c3_32 = arith.constant 3 : index
    %c0_33 = arith.constant 0 : index
    %c0_34 = arith.constant 0 : index
    %42 = vector.load %arg3[%c0_31, %c3_32, %c0_33, %c0_34] : memref<1x4x2x128xf32, #tpu.memory_space<vmem>>, vector<1x1x2x128xf32>
    %43 = vector.shape_cast %42 : vector<1x1x2x128xf32> to vector<2x128xf32>
    %44 = arith.subf %43, %15 : vector<2x128xf32>
    %45 = math.exp %44 : vector<2x128xf32>
    %46 = arith.addf %38, %45 : vector<2x128xf32>
    %c3_i32 = arith.constant 3 : i32
    %47 = vector.broadcast %c3_i32 : i32 to vector<2x128xi32>
    %48 = arith.cmpi eq, %4, %47 : vector<2x128xi32>
    %49 = arith.select %48, %44, %41 : vector<2x128xi1>, vector<2x128xf32>
    %50 = math.log %46 : vector<2x128xf32>
    %51 = arith.subf %49, %50 : vector<2x128xf32>
    %c0_35 = arith.constant 0 : index
    %c0_36 = arith.constant 0 : index
    %52 = vector.load %arg6[%c0_35, %c0_36] : memref<2x128xf32, #tpu.memory_space<vmem>>, vector<2x128xf32>
    %53 = arith.addf %52, %51 : vector<2x128xf32>
    %c0_37 = arith.constant 0 : index
    %c0_38 = arith.constant 0 : index
    %54 = vector.load %arg6[%c0_37, %c0_38] : memref<2x128xf32, #tpu.memory_space<vmem>>, vector<2x128xf32>
    tpu.vector_store %arg6[%c0_37, %c0_38], %53 {strides = array<i32>} : memref<2x128xf32, #tpu.memory_space<vmem>>, vector<2x128xf32>,
    %c0_i32_39 = arith.constant 0 : i32
    %55 = arith.cmpi eq, %arg2, %c0_i32_39 : i32
    %56 = arith.extui %55 : i1 to i32
    %c0_i32_40 = arith.constant 0 : i32
    %57 = arith.cmpi ne, %56, %c0_i32_40 : i32
    scf.if %57 {
      %c0_41 = arith.constant 0 : index
      %c0_42 = arith.constant 0 : index
      %58 = vector.load %arg6[%c0_41, %c0_42] : memref<2x128xf32, #tpu.memory_space<vmem>>, vector<2x128xf32>
      %59 = vector.shape_cast %58 : vector<2x128xf32> to vector<1x2x128xf32>
      %cst_43 = arith.constant dense<0.000000e+00> : vector<1xf32>
      %60 = vector.multi_reduction <add>, %59, %cst_43 [1, 2] : vector<1x2x128xf32> to vector<1xf32>
      %61 = vector.shape_cast %60 : vector<1xf32> to vector<1x1x1xf32>
      %62 = vector.extract %61[0, 0, 0] : f32 from vector<1x1x1xf32>
      %cst_44 = arith.constant -1.000000e+00 : f32
      %63 = arith.mulf %cst_44, %62 : f32
      %64 = tpu.iota {dimensions = array<i32: 2>} : vector<1x1x128xi32>
      %c0_i32_45 = arith.constant 0 : i32
      %65 = vector.broadcast %c0_i32_45 : i32 to vector<1x1x128xi32>
      %66 = arith.cmpi eq, %64, %65 : vector<1x1x128xi32>
      %cst_46 = arith.constant 0.000000e+00 : f32
      %67 = vector.broadcast %63 : f32 to vector<1x1x128xf32>
      %68 = vector.broadcast %cst_46 : f32 to vector<1x1x128xf32>
      %69 = arith.select %66, %67, %68 : vector<1x1x128xi1>, vector<1x1x128xf32>
      %c0_47 = arith.constant 0 : index
      %c0_48 = arith.constant 0 : index
      %c0_49 = arith.constant 0 : index
      %70 = vector.load %arg5[%c0_47, %c0_48, %c0_49] : memref<1x1x128xf32, #tpu.memory_space<vmem>>, vector<1x1x128xf32>
      tpu.vector_store %arg5[%c0_47, %c0_48, %c0_49], %69 {strides = array<i32>} : memref<1x1x128xf32, #tpu.memory_space<vmem>>, vector<1x1x128xf32>,
    } else {
    }
    return
  }
  func.func @transform_0(%arg0: i32, %arg1: i32, %arg2: i32) -> (i32, i32, i32, i32) {
    %c1_i32 = arith.constant 1 : i32
    %0 = arith.muli %arg1, %c1_i32 : i32
    %1 = arith.addi %0, %arg2 : i32
    %c0_i32 = arith.constant 0 : i32
    %c0_i32_0 = arith.constant 0 : i32
    %c0_i32_1 = arith.constant 0 : i32
    return %arg0, %c0_i32, %1, %c0_i32_0 : i32, i32, i32, i32
  }
  func.func @transform_1(%arg0: i32, %arg1: i32, %arg2: i32) -> (i32, i32, i32, i32) {
    %c1_i32 = arith.constant 1 : i32
    %0 = arith.muli %arg1, %c1_i32 : i32
    %1 = arith.addi %0, %arg2 : i32
    %c0_i32 = arith.constant 0 : i32
    %c0_i32_0 = arith.constant 0 : i32
    %c0_i32_1 = arith.constant 0 : i32
    return %arg0, %c0_i32, %1, %c0_i32_0 : i32, i32, i32, i32
  }
  func.func @transform_2(%arg0: i32, %arg1: i32, %arg2: i32) -> (i32, i32, i32) {
    %c1_i32 = arith.constant 1 : i32
    %0 = arith.muli %arg0, %c1_i32 : i32
    %1 = arith.addi %0, %arg1 : i32
    %c0_i32 = arith.constant 0 : i32
    %c0_i32_0 = arith.constant 0 : i32
    %c0_i32_1 = arith.constant 0 : i32
    return %1, %c0_i32, %c0_i32_0 : i32, i32, i32
  }
}

</mosaic_0001>

<bundles_post_ra>
// kernel: tpu_custom_call.1
= control target key start
LH: loop header
LB: loop body
LE: loop exit
PB: predicated region body
PF: predicated region fallthrough
CT: control target
= control target key end

     0   :  { %7 = vsyncpa [#allocation4], 0  ;;  %s831_s0 = inlined_call_operand.hbm [shape: f32[2,4,2,128], index: 0, kind: input, shape index: {}]   ;;  %s832_s1 = inlined_call_operand.hbm [shape: s32[2,1,2,128], index: 1, kind: input, shape index: {}]   ;;  %s833_s2 = inlined_call_operand.hbm [shape: f32[2,1,128], index: 2, kind: output, shape index: {}]  }
   0x1   :  { %9 = vsyncpa [#allocation4 + $0x1], 0 }
   0x2   :  { %10 = vsyncpa [#allocation7], 0 }
   0x3   :  { %12 = vsyncpa [#allocation7 + $0x1], 0 }
   0x4   :  { %13 = vsyncpa [#allocation5], 0 }
   0x5   :  { %15 = vsyncpa [#allocation5 + $0x1], 0  ;;  %s692_s9 = smov 0   ;;  %s694_s10 = smov 0  }
   0x6   :  { %s696_s11 = smov 0   ;;  %s698_s12 = smov 0  }
   0x7   :  { %s700_s13 = smov 0   ;;  %s702_s14 = smov 0  }
   0x8 LB: > { %s426_s15 = sadd.s32 4294967295, %s672_s14   ;;  %s427_s16 = sadd.s32 4294967294, %s672_s14   ;;  %s672_s14 = sphi %s702_s14, %s21_s14   ;;  %s668_s13 = sphi %s700_s13, %s843_s13   ;;  %s664_s12 = sphi %s698_s12, %s842_s12   ;;  %s660_s11 = sphi %s696_s11, %s841_s11   ;;  %s656_s10 = sphi %s694_s10, %s840_s10   ;;  %s652_s9 = sphi %s692_s9, %s839_s9  }
   0x9   : > { %s40_s17 = sadd.s32 1, %s668_s13  ;;  %s51_s18 = sadd.s32 1, %s660_s11 }
   0xa   : > { %p42_p0 = scmp.ge.s32.totalorder %s40_s17, 2  ;;  %p58_p1 = scmp.ne.s32.totalorder %s660_s11, %s656_s10 }
   0xb   : > { %p59_p2 = scmp.eq.s32.totalorder %s672_s14, 0  ;;  %p64_p3 = scmp.ne.s32.totalorder %s656_s10, %s652_s9 }
   0xc   : > { %s845_s17 = smov (%p42_p0, %s40_s17), 0  ;;  %p65_p5 = scmp.eq.s32.totalorder %s426_s15, 0 }
   0xd   : > { %p733_p4 = por %p59_p2, %p58_p1  ;;  %s46_s20 = ssub.s32 %s668_s13, %s845_s17 }
   0xe   : > { %p120_p6 = scmp.eq.s32.totalorder %s426_s15, 1  ;;  %p49_p7 = scmp.eq.s32.totalorder %s46_s20, 0 }
   0xf   : > { %p739_p8 = por %p65_p5, %p64_p3  ;;  %p126_p10 = scmp.eq.s32.totalorder %s427_s16, 1 }
  0x10   : > { %p743_p9 = por %p120_p6, %p58_p1  ;;  %p429_p12 = scmp.ge.s32.totalorder %s672_s14, 2 }
  0x11   : > { %s748_s23 = scalar_select %p49_p7, %s660_s11, %s51_s18  }
  0x12   : > { %p750_p11 = por %p126_p10, %p64_p3  ;;  %p463_p13 = scmp.lt.s32.totalorder %s672_s14, 2 }
  0x13   : > { %s146_s25 = sand.u32 1, %s660_s11   ;;  %s443_s27 = sshll.u32 %s668_s13, 3 }
  0x14   : > { %s430_s26 = sshll.u32 %s146_s25, 3  ;;  %s157_s30 = scalar_lea.hbm %s831_s0, %s443_s27 }
  0x15   : > { %s150_s3 = scalar_lea.vmem [#allocation3], %s430_s26  ;;  %s158_s5 = sshll.u32 %s157_s30, 4  ;;  %s159_s5 = int_to_ptr.hbm [resolvable:$true] %s158_s5 }
  0x16   : > { %s160_s4 = sshll.u32 %s150_s3, 4  ;;  %p763_p0 = pnand %p463_p13, %p733_p4  ;;  %s161_s4 = int_to_ptr.vmem [resolvable:$true] %s160_s4 }
  0x17   : > { %p435_p1 = scmp.ge.s32.totalorder %s672_s14, 1  ;;  %s147_s7 = scalar_lea.sflag [#allocation4], %s146_s25 }
  0x18   : > { %s674_s8 = smov 32   ;;  %s675_s15 = smov 2  }
  0x19   : > { %455 = dma.hbm_to_vmem [thread:$0]  (!%p763_p0), %s159_s5, 128, %s161_s4, %s147_s7, %s674_s8, %s674_s8, %s675_s15  }
  0x1a   : > { %p189_p2 = scmp.lt.s32.totalorder %s672_s14, 3  ;;  %s433_s16 = sshll.u32 %s146_s25, 1 }
  0x1b   : > { %s434_s18 = sshll.u32 %s668_s13, 1  ;;  %s174_s27 = scalar_lea.vmem [#allocation6], %s433_s16 }
  0x1c   : > { %p190_p3 = pnand %p435_p1, %p189_p2  ;;  %s180_s19 = scalar_lea.hbm %s832_s1, %s434_s18 }
  0x1d   : > { %s184_s28 = sshll.u32 %s174_s27, 4  ;;  %s182_s29 = sshll.u32 %s180_s19, 4  ;;  %s185_s28 = int_to_ptr.vmem [resolvable:$true] %s184_s28  ;;  %s183_s29 = int_to_ptr.hbm [resolvable:$true] %s182_s29 }
  0x1e   : > { %s171_s30 = scalar_lea.sflag [#allocation7], %s146_s25  ;;  %193 = sbr.rel (%p190_p3) target bundleno = 271 (0x10f), region = 28 }
  0x1f   : > { %458 = dma.hbm_to_vmem [thread:$0]  (!%p763_p0), %s183_s29, 32, %s185_s28, %s171_s30  }
  0x20   : > { %s778_s3 = sand.u32 (!%p190_p3), 1, %s656_s10  }
  0x21   : > { %s436_s4 = sshll.u32 (!%p190_p3), %s778_s3, 3  ;;  %s196_s5 = scalar_lea.sflag (!%p190_p3), [#allocation4], %s778_s3 }
  0x22   : > { %s199_s7 = scalar_lea.vmem (!%p190_p3), [#allocation3], %s436_s4 }
  0x23   : > { %639 = dma.done.wait (%p739_p8), %s196_s5, 128  }
  0x24   : > { %641 = vsyncadd (%p739_p8), %s196_s5, 4294967168  ;;  %s437_s25 = sshll.u32 %s778_s3, 1  ;;  %s206_s6 = scalar_lea.sflag [#allocation7], %s778_s3 }
  0x25   : > { %s209_s8 = scalar_lea.vmem [#allocation6], %s437_s25 }
  0x26   : > { %643 = dma.done.wait (%p739_p8), %s206_s6, 32  }
  0x27   : > { %645 = vsyncadd (%p739_p8), %s206_s6, 4294967264  ;;  %v676_v0 = vmov 0.0   ;;  %v244_v1 = vld [vmem:[%s199_s7] sm:$0x3]  ;;  %v438_v2 = vld [vmem:[%s199_s7 + $0x2] sm:$0x3]  ;;  %v300_v42 = vlaneseq  ;;  %s316_s16 = scalar_lea.hbm %s833_s2, %s664_s12 }
  0x28   : > { %242 = vst [vmem:[#allocation2] sm:$0x3] %v676_v0  ;;  %v247_v3 = vmax.f32 %v244_v1, %v438_v2  ;;  %v439_v4 = vld [vmem:[%s199_s7 + $0x4] sm:$0x3]  ;;  %v440_v5 = vld [vmem:[%s199_s7 + $0x6] sm:$0x3] }
  0x29   : > { %v243_v16 = vld [vmem:[%s209_s8] sm:$0x3]  ;;  %vm288_vm4 = vcmask 1041408   ;;  %v301_v43 = vand.u32 127, %v300_v42  ;;  %s234_s18 = scalar_lea.vmem [#allocation8], %s778_s3  ;;  %s320_s19 = sshll.u32 %s316_s16, 4  ;;  %s321_s19 = int_to_ptr.hbm [resolvable:$true] %s320_s19 }
  0x2a   : > { %v250_v6 = vmax.f32 %v247_v3, %v439_v4  ;;  %vm258_vm0 = vcmp.eq.s32.totalorder %v243_v16, 0  ;;  %vm264_vm1 = vcmp.eq.s32.totalorder %v243_v16, 1  ;;  %vm270_vm2 = vcmp.eq.s32.totalorder %v243_v16, 2  ;;  %s318_s20 = sshll.u32 %s234_s18, 4  ;;  %s307_s28 = scalar_lea.sflag [#allocation5], %s778_s3  ;;  %s319_s20 = int_to_ptr.vmem [resolvable:$true] %s318_s20 }
  0x2b   : > { %vm276_vm3 = vcmp.eq.s32.totalorder %v243_v16, 3  ;;  %vm302_vm5 = vcmp.eq.s32.totalorder %v301_v43, 0  ;;  %s600_s29 = sshra.s32 %s321_s19, 4  ;;  %s606_s5 = scalar_lea.hbm %s833_s2, 2  ;;  %s601_s29 = int_to_ptr.hbm [resolvable:$true] %s600_s29 }
  0x2c   : > { %v253_v7 = vmax.f32 %v250_v6, %v440_v5  ;;  %s602_s30 = scalar_lea.hbm %s601_s29, 1  ;;  %p607_p7 = scmp.lt.s32.totalorder %s601_s29, %s833_s2 }
  0x2d   : > { %p603_p4 = scmp.ne.s32.totalorder %s601_s29, %s602_s30  ;;  %p608_p8 = scmp.lt.s32.totalorder %s606_s5, %s602_s30 }
  0x2e   : > { %v254_v8 = vsub.f32 %v244_v1, %v253_v7  ;;  %v260_v9 = vsub.f32 %v438_v2, %v253_v7  ;;  %v266_v10 = vsub.f32 %v439_v4, %v253_v7  ;;  %v272_v11 = vsub.f32 %v440_v5, %v253_v7 }
  0x2f   : > { %v281_v30 = vld [vmem:[#allocation2] sm:$0x3]  ;;  %p604_p5 = pnand %p603_p4, %p743_p9  ;;  %p609_p10 = por %p608_p8, %p607_p7 }
  0x30   : > { %v255_v12 = vmul.f32 1.442695, %v254_v8  ;;  %v261_v13 = vmul.f32 1.442695, %v260_v9  ;;  %v267_v14 = vmul.f32 1.442695, %v266_v10 }
  0x31   : > { %v273_v15 = vmul.f32 1.442695, %v272_v11  ;;  %v259_v23 = vsel %vm258_vm0, %v254_v8, 0.0  ;;  %p605_p6 = pneg %p604_p5 }
  0x32   : > { %516 = vpow2.f32 %v255_v12  ;;  %v265_v25 = vsel %vm264_vm1, %v260_v9, %v259_v23 }
  0x33   : > { %518 = vpow2.f32 %v261_v13  ;;  %v271_v26 = vsel %vm270_vm2, %v266_v10, %v265_v25  ;;  %p610_p13 = pnand %p609_p10, %p605_p6 }
  0x34   : > { %520 = vpow2.f32 %v267_v14  ;;  %v277_v28 = vsel %vm276_vm3, %v272_v11, %v271_v26 }
  0x35   : > { %522 = vpow2.f32 %v273_v15 }
  0x38   : > { %v517_v17 = vpop.eup %516 }
  0x39   : > { %v519_v18 = vpop.eup %518 }
  0x3a   : > { %v521_v19 = vpop.eup %520  ;;  %v263_v20 = vadd.f32 %v519_v18, %v517_v17 }
  0x3b   : > { %v523_v21 = vpop.eup %522 }
  0x3c   : > { %v269_v22 = vadd.f32 %v521_v19, %v263_v20 }
  0x3e   : > { %v275_v24 = vadd.f32 %v523_v21, %v269_v22 }
  0x40   : > { %524 = vlog2.f32 %v275_v24 }
  0x46   : > { %v525_v27 = vpop.eup %524 }
  0x47   : > { %v279_v29 = vmul.f32 0.6931472, %v525_v27 }
  0x49   : > { %v280_v31 = vsub.f32 %v277_v28, %v279_v29 }
  0x4b   : > { %v282_v32 = vadd.f32 %v281_v30, %v280_v31 }
  0x4d   : > { %283 = vst [vmem:[#allocation2] sm:$0x3] %v282_v32 }
  0x54   : > { %v287_v33 = vld [vmem:[#allocation2] sm:$0x3] }
  0x55   : > { %v289_v34 = vsel %vm288_vm4, %v287_v33, 0.0 }
  0x56   : > { %290 = vadd.xlane.f32.xlu0 %v289_v34 }
  0xc9   : > { %v291_v35 = vpop.xlane.xlu0 %290 }
  0xca   : > { %v292_v36 = vrot.slane %v291_v35, 4 }
  0xcc   : > { %v293_v37 = vadd.f32 %v292_v36, %v291_v35 }
  0xce   : > { %v294_v38 = vrot.slane %v293_v37, 2 }
  0xd0   : > { %v295_v39 = vadd.f32 %v294_v38, %v293_v37 }
  0xd2   : > { %v296_v40 = vrot.slane %v295_v39, 1 }
  0xd4   : > { %v297_v41 = vadd.f32 %v296_v40, %v295_v39 }
  0xd6   : > { %444 = vpush %v297_v41 }
 0x107   : > { %s445_s26 = spop %444 }
 0x108   : > { %s299_s27 = smul.f32 -1.0, %s445_s26 }
 0x10a   : > { %v303_v44 = vstv %s299_s27 }
 0x10b   : > { %v304_v45 = vsel %vm302_vm5, %v303_v44, 0.0 }
 0x10c   : > { %305 = vst [vmem:[%s234_s18] sm:$0x1] %v304_v45 }
 0x10d   : > { %613 = shalt.err (!%p610_p13)
}
 0x10e   : > { %450 = dma.vmem_to_hbm [thread:$0]  (%p743_p9), %s319_s20, 16, %s321_s19, %s307_s28  }
 0x10f PF: > { %s332_s3 = sand.u32 1, %s652_s9   ;;  %p460_p0 = pnand %p429_p12, %p750_p11 }
 0x110   : > { %s333_s6 = scalar_lea.sflag [#allocation5], %s332_s3 }
 0x111   : > { %p461_p1 = pneg %p460_p0 }
 0x113   : > { %647 = dma.done.wait (%p461_p1), %s333_s6, 16  }
 0x114   : > { %649 = vsyncadd (%p461_p1), %s333_s6, 4294967280  ;;  %s21_s14 = sadd.s32 1, %s672_s14   ;;  %s839_s9 = smov %s656_s10 }
 0x115   : > { %p18_p2 = scmp.ge.s32.totalorder %s21_s14, 4   ;;  %s840_s10 = smov %s660_s11 }
 0x116   : > { %s841_s11 = smov %s748_s23  ;;  %s842_s12 = smov %s668_s13 }
 0x117   : > { %s843_s13 = smov %s845_s17  ;;  %20 = sbr.rel (!%p18_p2) target bundleno = 8 (0x8), region = 97 }
 0x11c   :  { %338 = vsyncpa [#allocation4], 1 }
 0x11d   :  { %340 = vsyncpa [#allocation4 + $0x1], 1 }
 0x11e   :  { %341 = vsyncpa [#allocation7], 1 }
 0x11f   :  { %343 = vsyncpa [#allocation7 + $0x1], 1 }
 0x120   :  { %344 = vsyncpa [#allocation5], 1 }
 0x121   :  { %346 = vsyncpa [#allocation5 + $0x1], 1 }

</bundles_post_ra>
